<compile_context>
chip_gen: v6e
topology: v6e:2x2x1
jax: 0.10.0
libtpu: 0.0.40
codegen_flags: <defaults>
</compile_context>

<pallas_src>
import jax
import jax.numpy as jnp
from jax.experimental import pallas as pl
from jax.experimental.pallas import tpu as pltpu


def bm_forward_kernel(v_ref, w_ref, wt_ref, bh_ref, bv_ref, uh_ref, uv_ref, out_ref):
    """One fused Gibbs half-step: visible -> hidden -> visible'."""
    # visible is binary 0/1, so the bf16 cast is exact.
    v = v_ref[...].astype(jnp.bfloat16)                                  # (tb, nv)

    # hidden = bernoulli(sigmoid(v @ W + b_hidden))
    act_h = jnp.dot(v, w_ref[...], preferred_element_type=jnp.float32) + bh_ref[...]
    p_h = jax.nn.sigmoid(act_h)                                          # f32, EUP
    hidden = jnp.where(uh_ref[...] < p_h, 1.0, 0.0)                      # binary sample
    hidden_bf16 = hidden.astype(jnp.bfloat16)                            # exact (0/1)

    # visible_gibbs = bernoulli(sigmoid(hidden @ W.T + b_visible))
    # W.T is a separate (precomputed) input -> plain MXU matmul, no in-kernel transpose.
    act_v = jnp.dot(hidden_bf16, wt_ref[...],
                    preferred_element_type=jnp.float32) + bv_ref[...]
    p_v = jax.nn.sigmoid(act_v)
    out_ref[...] = jnp.where(uv_ref[...] < p_v, 1.0, 0.0).astype(out_ref.dtype)


def _batch_tile(batch: int) -> int:
    """Pick a batch tile: full batch when small, else a divisor multiple of 8."""
    if batch <= 256:
        return batch
    for tb in (256, 128, 64, 32, 16, 8):
        if batch % tb == 0:
            return tb
    return batch  # fall back to a single full block


@jax.jit
def bm_forward(visible, W, b_visible, b_hidden, key):
    """Pallas equivalent of BM.forward: returns (visible, visible_gibbs)."""
    B, n_visible = visible.shape
    n_hidden = W.shape[1]

    # Per-call uniforms for the two Bernoulli draws (advance `key` between calls
    # for statistically independent samples): bernoulli(p) == (u < p).
    k_h, k_v = jax.random.split(key)
    u_h = jax.random.uniform(k_h, (B, n_hidden), dtype=jnp.float32)
    u_v = jax.random.uniform(k_v, (B, n_visible), dtype=jnp.float32)

    # bf16 MXU inputs; W.T materialized once per compile in the wrapper (tiny).
    w_bf16 = W.astype(jnp.bfloat16)
    wt_bf16 = w_bf16.T
    bh = b_hidden.reshape(1, n_hidden).astype(jnp.float32)
    bv = b_visible.reshape(1, n_visible).astype(jnp.float32)

    tb = _batch_tile(B)
    grid = (B // tb,)

    visible_gibbs = pl.pallas_call(
        bm_forward_kernel,
        out_shape=jax.ShapeDtypeStruct((B, n_visible), visible.dtype),
        grid_spec=pltpu.PrefetchScalarGridSpec(
            num_scalar_prefetch=0,
            grid=grid,
            in_specs=[
                pl.BlockSpec((tb, n_visible), lambda i: (i, 0)),   # visible tile
                pl.BlockSpec((n_visible, n_hidden), lambda i: (0, 0)),  # W (resident)
                pl.BlockSpec((n_hidden, n_visible), lambda i: (0, 0)),  # W.T (resident)
                pl.BlockSpec((1, n_hidden), lambda i: (0, 0)),     # b_hidden
                pl.BlockSpec((1, n_visible), lambda i: (0, 0)),    # b_visible
                pl.BlockSpec((tb, n_hidden), lambda i: (i, 0)),    # uniforms (hidden)
                pl.BlockSpec((tb, n_visible), lambda i: (i, 0)),   # uniforms (visible)
            ],
            out_specs=pl.BlockSpec((tb, n_visible), lambda i: (i, 0)),
        ),
        compiler_params=pltpu.CompilerParams(
            dimension_semantics=("parallel",)),
    )(visible, w_bf16, wt_bf16, bh, bv, u_h, u_v)

    return visible, visible_gibbs


def init_bm_params(key, n_visible, n_hidden):
    """Deterministic parameter init mirroring BM.__init__ shapes."""
    k_w, k_vv, k_hh = jax.random.split(key, 3)
    W = 0.1 * jax.random.normal(k_w, (n_visible, n_hidden), dtype=jnp.float32)
    # Wvv / Whh are defined in __init__ but unused by forward(); kept for parity.
    Wvv = 0.1 * jax.random.normal(k_vv, (n_visible, n_visible), dtype=jnp.float32)
    Whh = 0.1 * jax.random.normal(k_hh, (n_hidden, n_hidden), dtype=jnp.float32)
    b_visible = jnp.zeros((n_visible,), dtype=jnp.float32)
    b_hidden = jnp.zeros((n_hidden,), dtype=jnp.float32)
    return W, Wvv, Whh, b_visible, b_hidden


if __name__ == "__main__":
    batch = 8
    n_visible = 128
    n_hidden = 128   # lane-dense hidden width (multiple of 128)

    key = jax.random.PRNGKey(0)
    k_params, k_data, k_sample = jax.random.split(key, 3)

    W, Wvv, Whh, b_visible, b_hidden = init_bm_params(k_params, n_visible, n_hidden)

    # Binary visible units, like typical BM inputs.
    visible = jax.random.bernoulli(
        k_data, p=0.5, shape=(batch, n_visible)
    ).astype(jnp.float32)

    vis_out, vis_gibbs = bm_forward(visible, W, b_visible, b_hidden, k_sample)
    jax.block_until_ready((vis_out, vis_gibbs))

    assert vis_out.shape == (batch, n_visible)
    assert vis_gibbs.shape == (batch, n_visible)
    # Sampled visibles must be binary.
    assert bool(jnp.all((vis_gibbs == 0.0) | (vis_gibbs == 1.0)))
    # Input is passed through unchanged.
    assert bool(jnp.all(vis_out == visible))

    print("KERNEL_OK")
</pallas_src>

<mosaic_0001>
module attributes {stable_mosaic.version = 11 : i64} {
  func.func @bm_forward_kernel(%arg0: i32, %arg1: memref<8x128xf32, #tpu.memory_space<vmem>>, %arg2: memref<128x128xbf16, #tpu.memory_space<vmem>>, %arg3: memref<128x128xbf16, #tpu.memory_space<vmem>>, %arg4: memref<1x128xf32, #tpu.memory_space<vmem>>, %arg5: memref<1x128xf32, #tpu.memory_space<vmem>>, %arg6: memref<8x128xf32, #tpu.memory_space<vmem>>, %arg7: memref<8x128xf32, #tpu.memory_space<vmem>>, %arg8: memref<8x128xf32, #tpu.memory_space<vmem>>) attributes {dimension_semantics = [#tpu.dimension_semantics<parallel>], iteration_bounds = array<i64: 1>, scalar_prefetch = 0 : i64, scratch_operands = 0 : i64, tpu.core_type = #tpu.core_type<tc>, window_params = [{transform_indices = @transform_0, window_bounds = array<i64: 8, 128>}, {pipeline_mode = #tpu.pipeline_mode<synchronous>, transform_indices = @transform_1, window_bounds = array<i64: 128, 128>}, {pipeline_mode = #tpu.pipeline_mode<synchronous>, transform_indices = @transform_2, window_bounds = array<i64: 128, 128>}, {pipeline_mode = #tpu.pipeline_mode<synchronous>, transform_indices = @transform_3, window_bounds = array<i64: 1, 128>}, {pipeline_mode = #tpu.pipeline_mode<synchronous>, transform_indices = @transform_4, window_bounds = array<i64: 1, 128>}, {transform_indices = @transform_5, window_bounds = array<i64: 8, 128>}, {transform_indices = @transform_6, window_bounds = array<i64: 8, 128>}, {transform_indices = @transform_7, window_bounds = array<i64: 8, 128>}]} {
    %c0 = arith.constant 0 : index
    %c0_0 = arith.constant 0 : index
    %0 = vector.load %arg1[%c0, %c0_0] : memref<8x128xf32, #tpu.memory_space<vmem>>, vector<8x128xf32>
    %1 = arith.truncf %0 : vector<8x128xf32> to vector<8x128xbf16>
    %c0_1 = arith.constant 0 : index
    %c0_2 = arith.constant 0 : index
    %2 = vector.load %arg2[%c0_1, %c0_2] : memref<128x128xbf16, #tpu.memory_space<vmem>>, vector<128x128xbf16>
    %cst = arith.constant dense<0.000000e+00> : vector<8x128xf32>
    %3 = tpu.matmul %1, %2, %cst {dimension_numbers = #tpu.dot_dimension_numbers<[1], [0], [0], [1], [0, 0, 1, 1], [], []>} : vector<8x128xbf16>, vector<128x128xbf16>, vector<8x128xf32> -> vector<8x128xf32>
    %c0_3 = arith.constant 0 : index
    %c0_4 = arith.constant 0 : index
    %4 = vector.load %arg4[%c0_3, %c0_4] : memref<1x128xf32, #tpu.memory_space<vmem>>, vector<1x128xf32>
    %5 = vector.broadcast %4 : vector<1x128xf32> to vector<8x128xf32>
    %6 = arith.addf %3, %5 : vector<8x128xf32>
    %7 = arith.negf %6 : vector<8x128xf32>
    %8 = math.exp %7 : vector<8x128xf32>
    %cst_5 = arith.constant 1.000000e+00 : f32
    %9 = vector.broadcast %cst_5 : f32 to vector<8x128xf32>
    %10 = arith.addf %9, %8 : vector<8x128xf32>
    %11 = arith.divf %9, %10 : vector<8x128xf32>
    %c0_6 = arith.constant 0 : index
    %c0_7 = arith.constant 0 : index
    %12 = vector.load %arg6[%c0_6, %c0_7] : memref<8x128xf32, #tpu.memory_space<vmem>>, vector<8x128xf32>
    %13 = arith.cmpf olt, %12, %11 : vector<8x128xf32>
    %cst_8 = arith.constant 1.000000e+00 : f32
    %cst_9 = arith.constant 0.000000e+00 : f32
    %14 = vector.broadcast %cst_8 : f32 to vector<8x128xf32>
    %15 = vector.broadcast %cst_9 : f32 to vector<8x128xf32>
    %16 = arith.select %13, %14, %15 : vector<8x128xi1>, vector<8x128xf32>
    %17 = arith.truncf %16 : vector<8x128xf32> to vector<8x128xbf16>
    %c0_10 = arith.constant 0 : index
    %c0_11 = arith.constant 0 : index
    %18 = vector.load %arg3[%c0_10, %c0_11] : memref<128x128xbf16, #tpu.memory_space<vmem>>, vector<128x128xbf16>
    %cst_12 = arith.constant dense<0.000000e+00> : vector<8x128xf32>
    %19 = tpu.matmul %17, %18, %cst_12 {dimension_numbers = #tpu.dot_dimension_numbers<[1], [0], [0], [1], [0, 0, 1, 1], [], []>} : vector<8x128xbf16>, vector<128x128xbf16>, vector<8x128xf32> -> vector<8x128xf32>
    %c0_13 = arith.constant 0 : index
    %c0_14 = arith.constant 0 : index
    %20 = vector.load %arg5[%c0_13, %c0_14] : memref<1x128xf32, #tpu.memory_space<vmem>>, vector<1x128xf32>
    %21 = vector.broadcast %20 : vector<1x128xf32> to vector<8x128xf32>
    %22 = arith.addf %19, %21 : vector<8x128xf32>
    %23 = arith.negf %22 : vector<8x128xf32>
    %24 = math.exp %23 : vector<8x128xf32>
    %cst_15 = arith.constant 1.000000e+00 : f32
    %25 = vector.broadcast %cst_15 : f32 to vector<8x128xf32>
    %26 = arith.addf %25, %24 : vector<8x128xf32>
    %27 = arith.divf %25, %26 : vector<8x128xf32>
    %c0_16 = arith.constant 0 : index
    %c0_17 = arith.constant 0 : index
    %28 = vector.load %arg7[%c0_16, %c0_17] : memref<8x128xf32, #tpu.memory_space<vmem>>, vector<8x128xf32>
    %29 = arith.cmpf olt, %28, %27 : vector<8x128xf32>
    %cst_18 = arith.constant 1.000000e+00 : f32
    %cst_19 = arith.constant 0.000000e+00 : f32
    %30 = vector.broadcast %cst_18 : f32 to vector<8x128xf32>
    %31 = vector.broadcast %cst_19 : f32 to vector<8x128xf32>
    %32 = arith.select %29, %30, %31 : vector<8x128xi1>, vector<8x128xf32>
    %c0_20 = arith.constant 0 : index
    %c0_21 = arith.constant 0 : index
    %33 = vector.load %arg8[%c0_20, %c0_21] : memref<8x128xf32, #tpu.memory_space<vmem>>, vector<8x128xf32>
    tpu.vector_store %arg8[%c0_20, %c0_21], %32 {strides = array<i32>} : memref<8x128xf32, #tpu.memory_space<vmem>>, vector<8x128xf32>,
    return
  }
  func.func @transform_0(%arg0: i32) -> (i32, i32) {
    %c0_i32 = arith.constant 0 : i32
    %c0_i32_0 = arith.constant 0 : i32
    return %arg0, %c0_i32 : i32, i32
  }
  func.func @transform_1(%arg0: i32) -> (i32, i32) {
    %c0_i32 = arith.constant 0 : i32
    %c0_i32_0 = arith.constant 0 : i32
    %c0_i32_1 = arith.constant 0 : i32
    return %c0_i32, %c0_i32_0 : i32, i32
  }
  func.func @transform_2(%arg0: i32) -> (i32, i32) {
    %c0_i32 = arith.constant 0 : i32
    %c0_i32_0 = arith.constant 0 : i32
    %c0_i32_1 = arith.constant 0 : i32
    return %c0_i32, %c0_i32_0 : i32, i32
  }
  func.func @transform_3(%arg0: i32) -> (i32, i32) {
    %c0_i32 = arith.constant 0 : i32
    %c0_i32_0 = arith.constant 0 : i32
    %c0_i32_1 = arith.constant 0 : i32
    return %c0_i32, %c0_i32_0 : i32, i32
  }
  func.func @transform_4(%arg0: i32) -> (i32, i32) {
    %c0_i32 = arith.constant 0 : i32
    %c0_i32_0 = arith.constant 0 : i32
    %c0_i32_1 = arith.constant 0 : i32
    return %c0_i32, %c0_i32_0 : i32, i32
  }
  func.func @transform_5(%arg0: i32) -> (i32, i32) {
    %c0_i32 = arith.constant 0 : i32
    %c0_i32_0 = arith.constant 0 : i32
    return %arg0, %c0_i32 : i32, i32
  }
  func.func @transform_6(%arg0: i32) -> (i32, i32) {
    %c0_i32 = arith.constant 0 : i32
    %c0_i32_0 = arith.constant 0 : i32
    return %arg0, %c0_i32 : i32, i32
  }
  func.func @transform_7(%arg0: i32) -> (i32, i32) {
    %c0_i32 = arith.constant 0 : i32
    %c0_i32_0 = arith.constant 0 : i32
    return %arg0, %c0_i32 : i32, i32
  }
}

</mosaic_0001>

<bundles_post_ra>
// kernel: bm_forward.3
= control target key start
LH: loop header
LB: loop body
LE: loop exit
PB: predicated region body
PF: predicated region fallthrough
CT: control target
= control target key end

     0   :  { %v416_v1 = vmov 0.0   ;;  %vm417_vm0 = vmmov 0   ;;  %s545_s0 = inlined_call_operand.vmem [shape: f32[8,128], index: 0, kind: input, shape index: {}]   ;;  %s546_s1 = inlined_call_operand.vmem [shape: bf16[128,128], index: 1, kind: input, shape index: {}]   ;;  %s547_s2 = inlined_call_operand.vmem [shape: bf16[128,128], index: 2, kind: input, shape index: {}]   ;;  %s548_s3 = inlined_call_operand.vmem [shape: f32[1,128], index: 3, kind: input, shape index: {}]   ;;  %s549_s4 = inlined_call_operand.vmem [shape: f32[1,128], index: 4, kind: input, shape index: {}]   ;;  %s550_s5 = inlined_call_operand.vmem [shape: f32[8,128], index: 5, kind: input, shape index: {}]   ;;  %s551_s6 = inlined_call_operand.vmem [shape: f32[8,128], index: 6, kind: input, shape index: {}]   ;;  %s552_s7 = inlined_call_operand.hbm [shape: f32[8,128], index: 7, kind: output, shape index: {}]  }
   0x1   :  { %v370_v0 = vld [vmem:[%s546_s1 + $0x38] sm:$0xff]   ;;  %326 = vmatprep.subr.bf16.mxu0 %v416_v1  ;;  %346 = vmatprep.subr.bf16.mxu1 %v416_v1  ;;  %v371_v2 = vld [vmem:[%s546_s1 + $0x30] sm:$0xff]   ;;  %v372_v3 = vld [vmem:[%s546_s1 + $0x28] sm:$0xff]  }
   0x2   :  { %327 = vmatpush3.bf16.msra.mxu0 %v370_v0  ;;  %342 = vmatprep.mubr.msk.bf16.mxu0 %vm417_vm0, %v416_v1  ;;  %v373_v4 = vld [vmem:[%s546_s1 + $0x20] sm:$0xff]   ;;  %v374_v5 = vld [vmem:[%s546_s1 + $0x18] sm:$0xff]  }
   0x3   :  { %328 = vmatprep.subr.bf16.mxu0 %v416_v1  ;;  %362 = vmatprep.mubr.msk.bf16.mxu1 %vm417_vm0, %v416_v1 }
   0x6   :  { %329 = vmatpush3.bf16.msra.mxu0 %v371_v2 }
   0x7   :  { %330 = vmatprep.subr.bf16.mxu0 %v416_v1 }
   0xa   :  { %331 = vmatpush3.bf16.msra.mxu0 %v372_v3 }
   0xb   :  { %332 = vmatprep.subr.bf16.mxu0 %v416_v1 }
   0xe   :  { %333 = vmatpush3.bf16.msra.mxu0 %v373_v4 }
   0xf   :  { %12 = vsyncpa [#allocation3], 0  ;;  %334 = vmatprep.subr.bf16.mxu0 %v416_v1  ;;  %v375_v6 = vld [vmem:[%s546_s1 + $0x10] sm:$0xff]   ;;  %v376_v7 = vld [vmem:[%s546_s1 + $0x8] sm:$0xff]   ;;  %v418_v30 = vmov 1.0|1.0  }
  0x10   :  { %v377_v8 = vld [vmem:[%s546_s1] sm:$0xff]   ;;  %v378_v11 = vld [vmem:[%s547_s2 + $0x38] sm:$0xff]   ;;  %v379_v12 = vld [vmem:[%s547_s2 + $0x30] sm:$0xff]   ;;  %s419_s15 = smov [#allocation2]  }
  0x11   :  { %v28_v9 = vld [vmem:[%s545_s0] sm:$0xff]  ;;  %347 = vmatpush3.bf16.msra.mxu1 %v378_v11  ;;  %v380_v13 = vld [vmem:[%s547_s2 + $0x28] sm:$0xff]   ;;  %v382_v15 = vld [vmem:[%s547_s2 + $0x18] sm:$0xff]   ;;  %s278_s16 = sshll.u32 %s419_s15, 4  ;;  %s279_s16 = int_to_ptr.vmem [resolvable:$true] %s278_s16 }
  0x12   :  { %335 = vmatpush3.bf16.msra.mxu0 %v374_v5  ;;  %v29_v10 = vpack.c.bf16 %v28_v9, %v28_v9  ;;  %348 = vmatprep.subr.bf16.mxu1 %v416_v1  ;;  %v381_v14 = vld [vmem:[%s547_s2 + $0x20] sm:$0xff]   ;;  %v383_v16 = vld [vmem:[%s547_s2 + $0x10] sm:$0xff]   ;;  %v384_v17 = vld [vmem:[%s547_s2 + $0x8] sm:$0xff]   ;;  %p399_p1 = scmp.lt.s32.totalorder %s279_s16, %s279_s16 }
  0x13   :  { %336 = vmatprep.subr.bf16.mxu0 %v416_v1  ;;  %v385_v18 = vld [vmem:[%s547_s2] sm:$0xff]  }
  0x14   :  { %v286_v19 = vld [vmem:[%s548_s3] ss:$0 sm:$0xff] }
  0x15   :  { %349 = vmatpush3.bf16.msra.mxu1 %v379_v12  ;;  %v147_v28 = vld [vmem:[%s550_s5] sm:$0xff] }
  0x16   :  { %337 = vmatpush3.bf16.msra.mxu0 %v375_v6  ;;  %350 = vmatprep.subr.bf16.mxu1 %v416_v1  ;;  %v296_v31 = vld [vmem:[%s549_s4] ss:$0 sm:$0xff]  ;;  %s394_s4 = scalar_lea.vmem %s279_s16, 128 }
  0x17   :  { %338 = vmatprep.subr.bf16.mxu0 %v416_v1  ;;  %v268_v40 = vld [vmem:[%s551_s6] sm:$0xff]  ;;  %p395_p0 = scmp.ne.s32.totalorder %s279_s16, %s394_s4  ;;  %p400_p2 = scmp.lt.s32.totalorder %s394_s4, %s394_s4 }
  0x19   :  { %351 = vmatpush3.bf16.msra.mxu1 %v380_v13  ;;  %p401_p3 = por %p400_p2, %p399_p1 }
  0x1a   :  { %339 = vmatpush3.bf16.msra.mxu0 %v376_v7  ;;  %352 = vmatprep.subr.bf16.mxu1 %v416_v1 }
  0x1b   :  { %340 = vmatprep.subr.bf16.mxu0 %v416_v1  ;;  %p402_p4 = pnand %p401_p3, %p395_p0 }
  0x1d   :  { %353 = vmatpush3.bf16.msra.mxu1 %v381_v14 }
  0x1e   :  { %341 = vmatpush3.bf16.msra.mxu0 %v377_v8  ;;  %354 = vmatprep.subr.bf16.mxu1 %v416_v1 }
  0x21   :  { %343 = vmatmul.mubr.bf16.vlgmr.msra.gmra.mxu0 %v29_v10  ;;  %355 = vmatpush3.bf16.msra.mxu1 %v382_v15 }
  0x22   :  { %356 = vmatprep.subr.bf16.mxu1 %v416_v1 }
  0x25   :  { %357 = vmatpush3.bf16.msra.mxu1 %v383_v16 }
  0x26   :  { %358 = vmatprep.subr.bf16.mxu1 %v416_v1 }
  0x29   :  { %359 = vmatpush3.bf16.msra.mxu1 %v384_v17 }
  0x2a   :  { %360 = vmatprep.subr.bf16.mxu1 %v416_v1 }
  0x2d   :  { %361 = vmatpush3.bf16.msra.mxu1 %v385_v18 }
  0xe1   :  { %v135_v20 = vpop.f32.mrf.mxu0 }
  0xe2   :  { %v136_v21 = vadd.f32 %v286_v19, %v135_v20 }
  0xe3   :  { %v344_v22 = vpop.f32.mrf.mxu0 }
  0xe4   :  { %v295_v23 = vmul.f32 -1.442695, %v136_v21 }
  0xe5   :  { %v138_v24 = vpop.f32.mrf.mxu0 }
  0xe6   :  { %386 = vpow2.f32 %v295_v23 }
  0xe7   :  { %v345_v25 = vpop.f32.mrf.mxu0 }
  0xf3   :  { %v387_v26 = vpop.eup %386 }
  0xf4   :  { %v144_v27 = vadd.f32 1.0, %v387_v26 }
  0xf6   :  { %388 = vrcp.f32 %v144_v27 }
 0x103   :  { %v389_v29 = vpop.eup %388 }
 0x104   :  { %vm148_vm1 = vcmp.lt.f32.partialorder %v147_v28, %v389_v29 }
 0x105   :  { %vm305_vm2 = vmpackc.low %vm148_vm1, %vm148_vm1 }
 0x106   :  { %363 = vmatmul.mubr.msk.bf16.vlgmr.msra.gmra.mxu1 %vm305_vm2, %v418_v30 }
 0x1c6   :  { %v256_v32 = vpop.f32.mrf.mxu1 }
 0x1c7   :  { %v257_v33 = vadd.f32 %v296_v31, %v256_v32 }
 0x1c8   :  { %v364_v34 = vpop.f32.mrf.mxu1 }
 0x1c9   :  { %v307_v35 = vmul.f32 -1.442695, %v257_v33 }
 0x1ca   :  { %v259_v36 = vpop.f32.mrf.mxu1 }
 0x1cb   :  { %390 = vpow2.f32 %v307_v35 }
 0x1cc   :  { %v365_v37 = vpop.f32.mrf.mxu1 }
 0x1d8   :  { %v391_v38 = vpop.eup %390 }
 0x1d9   :  { %v265_v39 = vadd.f32 1.0, %v391_v38 }
 0x1db   :  { %392 = vrcp.f32 %v265_v39 }
 0x1e8   :  { %v393_v41 = vpop.eup %392 }
 0x1e9   :  { %vm269_vm3 = vcmp.lt.f32.partialorder %v268_v40, %v393_v41 }
 0x1ea   :  { %v270_v42 = vsel %vm269_vm3, 1.0, %v416_v1 }
 0x1eb   :  { %271 = vst [vmem:[#allocation2] sm:$0xff] %v270_v42 }
 0x1ec   :  { %405 = shalt.err (!%p402_p4)
}
 0x1ed   :  { %281 = dma.vmem_to_hbm [thread:$0]  %s279_s16, 128, %s552_s7, [#allocation3]  }
 0x1ee   :  { %414 = dma.done.wait [#allocation3], 128  }
 0x1ef   :  { %415 = vsyncadd [#allocation3], 4294967168 }
 0x1f0   :  { %285 = vsyncpa [#allocation3], 1 }

</bundles_post_ra>
